<compile_context>
chip_gen: v5e
topology: v5e:2x2
jax: 0.10.0
libtpu: 0.0.40
codegen_flags: <defaults>
</compile_context>

<pallas_src>
import functools

import jax
import jax.numpy as jnp
from jax.experimental import pallas as pl
from jax.experimental.pallas import tpu as pltpu

_INV_SQRT2 = 0.7071067811865476
_LN_EPS = 1e-12


def _round_up(x, m):
    return ((x + m - 1) // m) * m


def _balanced_tile(total, target, align):
    """Pick (tile, padded_total): tile aligned to `align`, waste minimized."""
    total_a = _round_up(total, align)
    if total_a <= target:
        return total_a, total_a
    nt = -(-total_a // target)                       # ceil-div: number of tiles
    tile = _round_up(-(-total_a // nt), align)
    return tile, tile * nt


def _ernie_ent_head_kernel(x_ref, w_ref, b_ref, gamma_ref, beta_ref,
                           cand_t_ref, out_ref, h_ref, *, e_true, e_pad):
    # x_ref:      (TM, E_pad)    row tile of flattened hidden states
    # w_ref:      (E_pad, E_pad) dense weight stored (in, out)  (== torch W.T, zero padded)
    # b_ref:      (1, E_pad)     dense bias            (zero padded)
    # gamma/beta: (1, E_pad)     LayerNorm affine      (zero padded)
    # cand_t_ref: (E_pad, TN)    candidate embeddings, pre-transposed, zero padded
    # out_ref:    (TM, TN)
    # h_ref:      (TM, E_pad)    scratch holding the transformed rows (MXU feed dtype)

    # The transform (dense -> gelu -> layernorm) only depends on the row tile, so
    # compute it once per row tile (first candidate tile) and reuse across all TN tiles.
    @pl.when(pl.program_id(1) == 0)
    def _():
        # Dense: native-dtype MXU matmul, f32 accumulate.
        h = jnp.dot(x_ref[...], w_ref[...], preferred_element_type=jnp.float32)
        h = h + b_ref[...].astype(jnp.float32)

        # Exact (erf-based) GELU — matches torch.nn.functional.gelu default.
        h = 0.5 * h * (1.0 + jax.lax.erf(h * _INV_SQRT2))

        # LayerNorm over the TRUE entity width. Padded lanes of h are exact zeros
        # (zero-padded W columns / bias, gelu(0) == 0), so only the centering needs
        # an explicit lane mask before the variance sum.
        inv_e = 1.0 / float(e_true)
        mean = jnp.sum(h, axis=-1, keepdims=True) * inv_e
        centered = h - mean
        if e_pad != e_true:
            col = jax.lax.broadcasted_iota(jnp.int32, h.shape, 1)
            centered = jnp.where(col < e_true, centered, 0.0)
        var = jnp.sum(centered * centered, axis=-1, keepdims=True) * inv_e
        hn = centered * jax.lax.rsqrt(var + _LN_EPS)
        hn = (hn * gamma_ref[...].astype(jnp.float32)
              + beta_ref[...].astype(jnp.float32))
        # Store in MXU-feed dtype once; avoids a per-candidate-tile cast and halves
        # scratch VMEM when the model runs in bf16.
        h_ref[...] = hn.astype(h_ref.dtype)

    # Score against the current candidate tile: (TM, E_pad) @ (E_pad, TN).
    out_ref[...] = jnp.dot(
        h_ref[...], cand_t_ref[...],
        preferred_element_type=jnp.float32).astype(out_ref.dtype)


def ernie_ent_prediction_head(hidden_states, candidate, params, *,
                              tm=256, tn=512):
    """hidden_states: [B, S, E], candidate: [1, N, E] -> out [B, S, N].

    tm: target row-tile size (256 saturates v6e/v7x MXU; anything >=128 is fine on v5e).
    tn: target candidate-tile size (multiple of 128 -> lane-dense output stores).
    """
    B, S, E = hidden_states.shape
    cand = jnp.squeeze(candidate, 0)                           # (N, E)
    N = cand.shape[0]
    R = B * S
    dtype = hidden_states.dtype

    # --- padding / tiling decisions (all static) --------------------------------
    E_pad = _round_up(E, 128)
    TM, R_pad = _balanced_tile(R, tm, 8)       # sublane-aligned row tiles
    TN, N_pad = _balanced_tile(N, tn, 128)     # lane-dense candidate tiles

    # --- zero-pad operands so everything is (8,128)-tile friendly ---------------
    x2 = hidden_states.reshape(R, E)
    x2 = jnp.pad(x2, ((0, R_pad - R), (0, E_pad - E)))
    w = jnp.pad(params["dense_w"].astype(dtype), ((0, E_pad - E), (0, E_pad - E)))
    b = jnp.pad(params["dense_b"], (0, E_pad - E)).reshape(1, E_pad)
    gamma = jnp.pad(params["ln_gamma"], (0, E_pad - E)).reshape(1, E_pad)
    beta = jnp.pad(params["ln_beta"], (0, E_pad - E)).reshape(1, E_pad)
    cand_t = jnp.pad(cand.astype(dtype), ((0, N_pad - N), (0, E_pad - E))).T  # (E_pad, N_pad)

    grid = (R_pad // TM, N_pad // TN)

    # Advisory cost for XLA's scheduler.
    itemsize = jnp.dtype(dtype).itemsize
    cost = pl.CostEstimate(
        flops=2 * R_pad * E_pad * E_pad + 2 * R_pad * E_pad * N_pad,
        transcendentals=R_pad * E_pad,
        bytes_accessed=int(x2.nbytes + w.nbytes + b.nbytes + gamma.nbytes
                           + beta.nbytes + cand_t.nbytes
                           + R_pad * N_pad * itemsize),
    )

    # Per-step VMEM estimate (double-buffered x / cand / out tiles, resident W +
    # params, scratch).  Only raise the scoped limit when necessary so the same code
    # stays safe on v7x's smaller (64 MiB) physical VMEM.
    vmem_need = int(
        (2 * TM * E_pad + E_pad * E_pad + 3 * E_pad
         + 2 * E_pad * TN + 2 * TM * TN + TM * E_pad) * itemsize)
    cp_kwargs = dict(dimension_semantics=("parallel", "arbitrary"))
    if vmem_need > 32 * 1024 * 1024:
        cp_kwargs["vmem_limit_bytes"] = min(2 * vmem_need, 64 * 1024 * 1024)

    kernel = functools.partial(_ernie_ent_head_kernel, e_true=E, e_pad=E_pad)

    out_padded = pl.pallas_call(
        kernel,
        out_shape=jax.ShapeDtypeStruct((R_pad, N_pad), dtype),
        grid_spec=pltpu.PrefetchScalarGridSpec(
            num_scalar_prefetch=0,
            grid=grid,
            in_specs=[
                pl.BlockSpec((TM, E_pad), lambda i, n: (i, 0)),      # x rows
                pl.BlockSpec((E_pad, E_pad), lambda i, n: (0, 0)),   # dense W (resident)
                pl.BlockSpec((1, E_pad), lambda i, n: (0, 0)),       # bias
                pl.BlockSpec((1, E_pad), lambda i, n: (0, 0)),       # ln gamma
                pl.BlockSpec((1, E_pad), lambda i, n: (0, 0)),       # ln beta
                pl.BlockSpec((E_pad, TN), lambda i, n: (0, n)),      # cand^T tile
            ],
            out_specs=pl.BlockSpec((TM, TN), lambda i, n: (i, n)),
            scratch_shapes=[pltpu.VMEM((TM, E_pad), dtype)],
        ),
        compiler_params=pltpu.CompilerParams(**cp_kwargs),
        cost_estimate=cost,
    )(x2, w, b, gamma, beta, cand_t)

    return out_padded[:R, :N].reshape(B, S, N)


def _reference(hidden_states, candidate, params):
    """Pure-JAX reference of the PyTorch forward, for a correctness check."""
    w = params["dense_w"]
    h = hidden_states @ w + params["dense_b"]
    h = 0.5 * h * (1.0 + jax.lax.erf(h * _INV_SQRT2))
    mean = jnp.mean(h, axis=-1, keepdims=True)
    var = jnp.mean((h - mean) ** 2, axis=-1, keepdims=True)
    h = (h - mean) / jnp.sqrt(var + _LN_EPS)
    h = h * params["ln_gamma"] + params["ln_beta"]
    cand = jnp.squeeze(candidate, 0)
    return h @ cand.T


if __name__ == "__main__":
    # Small shapes consistent with the module:
    #   batch=2, seq=8, entity_size=32 (config.ent.entity_size), entities in batch=16
    B, S, E, N = 2, 8, 32, 16

    key = jax.random.PRNGKey(0)
    k_x, k_c, k_w, k_b, k_g, k_be = jax.random.split(key, 6)

    hidden_states = jax.random.normal(k_x, (B, S, E), dtype=jnp.float32)
    candidate = jax.random.normal(k_c, (1, N, E), dtype=jnp.float32)

    # Deterministic synthetic parameters (shapes match nn.Linear(E, E) + LayerNorm(E)).
    params = {
        # stored (in, out): equivalent to torch weight (out, in) transposed
        "dense_w": jax.random.normal(k_w, (E, E), dtype=jnp.float32) * 0.02,
        "dense_b": jax.random.normal(k_b, (E,), dtype=jnp.float32) * 0.02,
        "ln_gamma": 1.0 + 0.01 * jax.random.normal(k_g, (E,), dtype=jnp.float32),
        "ln_beta": 0.01 * jax.random.normal(k_be, (E,), dtype=jnp.float32),
    }

    out = ernie_ent_prediction_head(hidden_states, candidate, params)
    out = jax.block_until_ready(out)

    ref = _reference(hidden_states, candidate, params)
    assert out.shape == (B, S, N), out.shape
    assert jnp.allclose(out, ref, atol=1e-4, rtol=1e-4), \
        float(jnp.max(jnp.abs(out - ref)))

    print("KERNEL_OK")
</pallas_src>

<mosaic_0001>
module attributes {stable_mosaic.version = 11 : i64} {
  func.func @_ernie_ent_head_kernel(%arg0: i32, %arg1: i32, %arg2: memref<16x128xf32, #tpu.memory_space<vmem>>, %arg3: memref<128x128xf32, #tpu.memory_space<vmem>>, %arg4: memref<1x128xf32, #tpu.memory_space<vmem>>, %arg5: memref<1x128xf32, #tpu.memory_space<vmem>>, %arg6: memref<1x128xf32, #tpu.memory_space<vmem>>, %arg7: memref<128x128xf32, #tpu.memory_space<vmem>>, %arg8: memref<16x128xf32, #tpu.memory_space<vmem>>, %arg9: memref<16x128xf32, #tpu.memory_space<vmem>>) attributes {dimension_semantics = [#tpu.dimension_semantics<parallel>, #tpu.dimension_semantics<arbitrary>], iteration_bounds = array<i64: 1, 1>, scalar_prefetch = 0 : i64, scratch_operands = 1 : i64, tpu.core_type = #tpu.core_type<tc>, window_params = [{transform_indices = @transform_0, window_bounds = array<i64: 16, 128>}, {pipeline_mode = #tpu.pipeline_mode<synchronous>, transform_indices = @transform_1, window_bounds = array<i64: 128, 128>}, {pipeline_mode = #tpu.pipeline_mode<synchronous>, transform_indices = @transform_2, window_bounds = array<i64: 1, 128>}, {pipeline_mode = #tpu.pipeline_mode<synchronous>, transform_indices = @transform_3, window_bounds = array<i64: 1, 128>}, {pipeline_mode = #tpu.pipeline_mode<synchronous>, transform_indices = @transform_4, window_bounds = array<i64: 1, 128>}, {transform_indices = @transform_5, window_bounds = array<i64: 128, 128>}, {transform_indices = @transform_6, window_bounds = array<i64: 16, 128>}]} {
    %c0_i32 = arith.constant 0 : i32
    %0 = arith.cmpi eq, %arg1, %c0_i32 : i32
    %1 = arith.extui %0 : i1 to i32
    %c0_i32_0 = arith.constant 0 : i32
    %2 = arith.cmpi ne, %1, %c0_i32_0 : i32
    scf.if %2 {
      %c0_6 = arith.constant 0 : index
      %c0_7 = arith.constant 0 : index
      %7 = vector.load %arg2[%c0_6, %c0_7] : memref<16x128xf32, #tpu.memory_space<vmem>>, vector<16x128xf32>
      %c0_8 = arith.constant 0 : index
      %c0_9 = arith.constant 0 : index
      %8 = vector.load %arg3[%c0_8, %c0_9] : memref<128x128xf32, #tpu.memory_space<vmem>>, vector<128x128xf32>
      %cst_10 = arith.constant dense<0.000000e+00> : vector<16x128xf32>
      %9 = tpu.matmul %7, %8, %cst_10 {dimension_numbers = #tpu.dot_dimension_numbers<[1], [0], [0], [1], [0, 0, 1, 1], [], []>} : vector<16x128xf32>, vector<128x128xf32>, vector<16x128xf32> -> vector<16x128xf32>
      %c0_11 = arith.constant 0 : index
      %c0_12 = arith.constant 0 : index
      %10 = vector.load %arg4[%c0_11, %c0_12] : memref<1x128xf32, #tpu.memory_space<vmem>>, vector<1x128xf32>
      %11 = vector.broadcast %10 : vector<1x128xf32> to vector<16x128xf32>
      %12 = arith.addf %9, %11 : vector<16x128xf32>
      %cst_13 = arith.constant 5.000000e-01 : f32
      %13 = vector.broadcast %cst_13 : f32 to vector<16x128xf32>
      %14 = arith.mulf %13, %12 : vector<16x128xf32>
      %cst_14 = arith.constant 0.707106769 : f32
      %15 = vector.broadcast %cst_14 : f32 to vector<16x128xf32>
      %16 = arith.mulf %12, %15 : vector<16x128xf32>
      %17 = math.erf %16 : vector<16x128xf32>
      %cst_15 = arith.constant 1.000000e+00 : f32
      %18 = vector.broadcast %cst_15 : f32 to vector<16x128xf32>
      %19 = arith.addf %18, %17 : vector<16x128xf32>
      %20 = arith.mulf %14, %19 : vector<16x128xf32>
      %cst_16 = arith.constant dense<0.000000e+00> : vector<16xf32>
      %21 = vector.multi_reduction <add>, %20, %cst_16 [1] : vector<16x128xf32> to vector<16xf32>
      %22 = vector.shape_cast %21 : vector<16xf32> to vector<16x1xf32>
      %cst_17 = arith.constant 3.125000e-02 : f32
      %23 = vector.broadcast %cst_17 : f32 to vector<16x1xf32>
      %24 = arith.mulf %22, %23 : vector<16x1xf32>
      %25 = vector.broadcast %24 : vector<16x1xf32> to vector<16x128xf32>
      %26 = arith.subf %20, %25 : vector<16x128xf32>
      %27 = tpu.iota {dimensions = array<i32: 1>} : vector<16x128xi32>
      %c32_i32 = arith.constant 32 : i32
      %28 = vector.broadcast %c32_i32 : i32 to vector<16x128xi32>
      %29 = arith.cmpi slt, %27, %28 : vector<16x128xi32>
      %cst_18 = arith.constant 0.000000e+00 : f32
      %30 = vector.broadcast %cst_18 : f32 to vector<16x128xf32>
      %31 = arith.select %29, %26, %30 : vector<16x128xi1>, vector<16x128xf32>
      %32 = arith.mulf %31, %31 : vector<16x128xf32>
      %cst_19 = arith.constant dense<0.000000e+00> : vector<16xf32>
      %33 = vector.multi_reduction <add>, %32, %cst_19 [1] : vector<16x128xf32> to vector<16xf32>
      %34 = vector.shape_cast %33 : vector<16xf32> to vector<16x1xf32>
      %cst_20 = arith.constant 3.125000e-02 : f32
      %35 = vector.broadcast %cst_20 : f32 to vector<16x1xf32>
      %36 = arith.mulf %34, %35 : vector<16x1xf32>
      %cst_21 = arith.constant 9.99999996E-13 : f32
      %37 = vector.broadcast %cst_21 : f32 to vector<16x1xf32>
      %38 = arith.addf %36, %37 : vector<16x1xf32>
      %39 = math.rsqrt %38 : vector<16x1xf32>
      %40 = vector.broadcast %39 : vector<16x1xf32> to vector<16x128xf32>
      %41 = arith.mulf %31, %40 : vector<16x128xf32>
      %c0_22 = arith.constant 0 : index
      %c0_23 = arith.constant 0 : index
      %42 = vector.load %arg5[%c0_22, %c0_23] : memref<1x128xf32, #tpu.memory_space<vmem>>, vector<1x128xf32>
      %43 = vector.broadcast %42 : vector<1x128xf32> to vector<16x128xf32>
      %44 = arith.mulf %41, %43 : vector<16x128xf32>
      %c0_24 = arith.constant 0 : index
      %c0_25 = arith.constant 0 : index
      %45 = vector.load %arg6[%c0_24, %c0_25] : memref<1x128xf32, #tpu.memory_space<vmem>>, vector<1x128xf32>
      %46 = vector.broadcast %45 : vector<1x128xf32> to vector<16x128xf32>
      %47 = arith.addf %44, %46 : vector<16x128xf32>
      %c0_26 = arith.constant 0 : index
      %c0_27 = arith.constant 0 : index
      %48 = vector.load %arg9[%c0_26, %c0_27] : memref<16x128xf32, #tpu.memory_space<vmem>>, vector<16x128xf32>
      tpu.vector_store %arg9[%c0_26, %c0_27], %47 {strides = array<i32>} : memref<16x128xf32, #tpu.memory_space<vmem>>, vector<16x128xf32>,
    } else {
    }
    %c0 = arith.constant 0 : index
    %c0_1 = arith.constant 0 : index
    %3 = vector.load %arg9[%c0, %c0_1] : memref<16x128xf32, #tpu.memory_space<vmem>>, vector<16x128xf32>
    %c0_2 = arith.constant 0 : index
    %c0_3 = arith.constant 0 : index
    %4 = vector.load %arg7[%c0_2, %c0_3] : memref<128x128xf32, #tpu.memory_space<vmem>>, vector<128x128xf32>
    %cst = arith.constant dense<0.000000e+00> : vector<16x128xf32>
    %5 = tpu.matmul %3, %4, %cst {dimension_numbers = #tpu.dot_dimension_numbers<[1], [0], [0], [1], [0, 0, 1, 1], [], []>} : vector<16x128xf32>, vector<128x128xf32>, vector<16x128xf32> -> vector<16x128xf32>
    %c0_4 = arith.constant 0 : index
    %c0_5 = arith.constant 0 : index
    %6 = vector.load %arg8[%c0_4, %c0_5] : memref<16x128xf32, #tpu.memory_space<vmem>>, vector<16x128xf32>
    tpu.vector_store %arg8[%c0_4, %c0_5], %5 {strides = array<i32>} : memref<16x128xf32, #tpu.memory_space<vmem>>, vector<16x128xf32>,
    return
  }
  func.func @transform_0(%arg0: i32, %arg1: i32) -> (i32, i32) {
    %c0_i32 = arith.constant 0 : i32
    %c0_i32_0 = arith.constant 0 : i32
    return %arg0, %c0_i32 : i32, i32
  }
  func.func @transform_1(%arg0: i32, %arg1: i32) -> (i32, i32) {
    %c0_i32 = arith.constant 0 : i32
    %c0_i32_0 = arith.constant 0 : i32
    %c0_i32_1 = arith.constant 0 : i32
    return %c0_i32, %c0_i32_0 : i32, i32
  }
  func.func @transform_2(%arg0: i32, %arg1: i32) -> (i32, i32) {
    %c0_i32 = arith.constant 0 : i32
    %c0_i32_0 = arith.constant 0 : i32
    %c0_i32_1 = arith.constant 0 : i32
    return %c0_i32, %c0_i32_0 : i32, i32
  }
  func.func @transform_3(%arg0: i32, %arg1: i32) -> (i32, i32) {
    %c0_i32 = arith.constant 0 : i32
    %c0_i32_0 = arith.constant 0 : i32
    %c0_i32_1 = arith.constant 0 : i32
    return %c0_i32, %c0_i32_0 : i32, i32
  }
  func.func @transform_4(%arg0: i32, %arg1: i32) -> (i32, i32) {
    %c0_i32 = arith.constant 0 : i32
    %c0_i32_0 = arith.constant 0 : i32
    %c0_i32_1 = arith.constant 0 : i32
    return %c0_i32, %c0_i32_0 : i32, i32
  }
  func.func @transform_5(%arg0: i32, %arg1: i32) -> (i32, i32) {
    %c0_i32 = arith.constant 0 : i32
    %c0_i32_0 = arith.constant 0 : i32
    return %c0_i32, %arg1 : i32, i32
  }
  func.func @transform_6(%arg0: i32, %arg1: i32) -> (i32, i32) {
    %c0_i32 = arith.constant 0 : i32
    return %arg0, %arg1 : i32, i32
  }
}

</mosaic_0001>

<bundles_post_ra>
// kernel: tpu_custom_call.1
= control target key start
LH: loop header
LB: loop body
LE: loop exit
PB: predicated region body
PF: predicated region fallthrough
CT: control target
= control target key end

     0   :  { %11 = vsyncpa [#allocation4], 0  ;;  %s585_s0 = inlined_call_operand.hbm [shape: f32[16,128], index: 0, kind: input, shape index: {}]   ;;  %s586_s1 = inlined_call_operand.hbm [shape: f32[128,128], index: 1, kind: input, shape index: {}]   ;;  %s587_s2 = inlined_call_operand.vmem [shape: f32[1,128], index: 2, kind: input, shape index: {}]   ;;  %s588_s3 = inlined_call_operand.vmem [shape: f32[1,128], index: 3, kind: input, shape index: {}]   ;;  %s589_s4 = inlined_call_operand.vmem [shape: f32[1,128], index: 4, kind: input, shape index: {}]   ;;  %s590_s5 = inlined_call_operand.hbm [shape: f32[128,128], index: 5, kind: input, shape index: {}]   ;;  %s591_s6 = inlined_call_operand.hbm [shape: f32[16,128], index: 6, kind: output, shape index: {}]  }
   0x1   :  { %12 = vsyncpa [#allocation7], 0 }
   0x2   :  { %13 = vsyncpa [#allocation5], 0  ;;  %s31_s23 = sshll.u32 %s586_s1, 4  ;;  %s483_s24 = smov [#allocation6]   ;;  %s32_s23 = int_to_ptr.hbm [resolvable:$true] %s31_s23 }
   0x3   :  { %s33_s25 = sshll.u32 %s483_s24, 4  ;;  %s18_s28 = sshll.u32 %s585_s0, 4  ;;  %s34_s25 = int_to_ptr.vmem [resolvable:$true] %s33_s25  ;;  %s19_s28 = int_to_ptr.hbm [resolvable:$true] %s18_s28 }
   0x4   :  { %s484_s29 = smov 128   ;;  %s485_s30 = smov 8  }
   0x5   :  { %39 = dma.hbm_to_vmem [thread:$0]  %s32_s23, 2048, %s34_s25, [#allocation7], %s484_s29, %s484_s29, %s485_s30  }
   0x6   :  { %s486_s7 = smov [#allocation3]   ;;  %s50_s1 = sshll.u32 %s590_s5, 4  ;;  %s51_s1 = int_to_ptr.hbm [resolvable:$true] %s50_s1 }
   0x7   :  { %s20_s8 = sshll.u32 %s486_s7, 4  ;;  %s487_s0 = smov [#allocation8]   ;;  %s21_s8 = int_to_ptr.vmem [resolvable:$true] %s20_s8 }
   0x8   :  { %26 = dma.hbm_to_vmem [thread:$0]  %s19_s28, 256, %s21_s8, [#allocation4], %s484_s29, %s484_s29, %s485_s30  }
   0x9   :  { %s52_s11 = sshll.u32 %s487_s0, 4  ;;  %s53_s11 = int_to_ptr.vmem [resolvable:$true] %s52_s11 }
   0xa   :  { %58 = dma.hbm_to_vmem [thread:$0]  %s51_s1, 2048, %s53_s11, [#allocation7], %s484_s29, %s484_s29, %s485_s30  }
   0xb   :  { %477 = dma.done.wait [#allocation4], 256  }
   0xc   :  { %478 = vsyncadd [#allocation4], 4294967040 }
   0xd   :  { %479 = dma.done.wait [#allocation7], 4096  }
   0xe   :  { %480 = vsyncadd [#allocation7], 4294963200  ;;  %v92_v0 = vld [vmem:[#allocation6 + $0x78] sm:$0xff]  ;;  %v91_v1 = vld [vmem:[#allocation6 + $0x70] sm:$0xff] }
   0xf   :  { %97 = vmatpush.msra.mxu0 %v92_v0  ;;  %332 = vmatpush.msra.mxu2 %v92_v0  ;;  %v90_v2 = vld [vmem:[#allocation6 + $0x68] sm:$0xff]  ;;  %v89_v3 = vld [vmem:[#allocation6 + $0x60] sm:$0xff]  ;;  %v88_v4 = vld [vmem:[#allocation6 + $0x58] sm:$0xff] }
  0x10   :  { %v87_v5 = vld [vmem:[#allocation6 + $0x50] sm:$0xff]  ;;  %v86_v6 = vld [vmem:[#allocation6 + $0x48] sm:$0xff]  ;;  %v85_v7 = vld [vmem:[#allocation6 + $0x40] sm:$0xff] }
  0x11   :  { %98 = vmatpush.msra.mxu0 %v91_v1  ;;  %333 = vmatpush.msra.mxu2 %v91_v1  ;;  %v84_v8 = vld [vmem:[#allocation6 + $0x38] sm:$0xff]  ;;  %v83_v9 = vld [vmem:[#allocation6 + $0x30] sm:$0xff]  ;;  %v82_v10 = vld [vmem:[#allocation6 + $0x28] sm:$0xff] }
  0x12   :  { %v81_v11 = vld [vmem:[#allocation6 + $0x20] sm:$0xff]  ;;  %v80_v12 = vld [vmem:[#allocation6 + $0x18] sm:$0xff]  ;;  %v79_v13 = vld [vmem:[#allocation6 + $0x10] sm:$0xff] }
  0x13   :  { %99 = vmatpush.msra.mxu0 %v90_v2  ;;  %334 = vmatpush.msra.mxu2 %v90_v2  ;;  %v78_v14 = vld [vmem:[#allocation6 + $0x8] sm:$0xff]  ;;  %v77_v15 = vld [vmem:[#allocation6] sm:$0xff]  ;;  %v75_v16 = vld [vmem:[#allocation3] sm:$0xff] }
  0x14   :  { %v76_v17 = vld [vmem:[#allocation3 + $0x8] sm:$0xff]  ;;  %v370_v18 = vld [vmem:[%s587_s2] ss:$0 sm:$0xff] }
  0x15   :  { %100 = vmatpush.msra.mxu0 %v89_v3  ;;  %335 = vmatpush.msra.mxu2 %v89_v3 }
  0x17   :  { %101 = vmatpush.msra.mxu0 %v88_v4  ;;  %336 = vmatpush.msra.mxu2 %v88_v4 }
  0x19   :  { %102 = vmatpush.msra.mxu0 %v87_v5  ;;  %337 = vmatpush.msra.mxu2 %v87_v5 }
  0x1b   :  { %103 = vmatpush.msra.mxu0 %v86_v6  ;;  %338 = vmatpush.msra.mxu2 %v86_v6 }
  0x1d   :  { %104 = vmatpush.msra.mxu0 %v85_v7  ;;  %339 = vmatpush.msra.mxu2 %v85_v7 }
  0x1f   :  { %105 = vmatpush.msra.mxu0 %v84_v8  ;;  %340 = vmatpush.msra.mxu2 %v84_v8 }
  0x21   :  { %106 = vmatpush.msra.mxu0 %v83_v9  ;;  %341 = vmatpush.msra.mxu2 %v83_v9 }
  0x23   :  { %107 = vmatpush.msra.mxu0 %v82_v10  ;;  %342 = vmatpush.msra.mxu2 %v82_v10 }
  0x25   :  { %108 = vmatpush.msra.mxu0 %v81_v11  ;;  %343 = vmatpush.msra.mxu2 %v81_v11 }
  0x27   :  { %109 = vmatpush.msra.mxu0 %v80_v12  ;;  %344 = vmatpush.msra.mxu2 %v80_v12 }
  0x29   :  { %110 = vmatpush.msra.mxu0 %v79_v13  ;;  %345 = vmatpush.msra.mxu2 %v79_v13 }
  0x2b   :  { %111 = vmatpush.msra.mxu0 %v78_v14  ;;  %346 = vmatpush.msra.mxu2 %v78_v14 }
  0x2d   :  { %112 = vmatpush.msra.mxu0 %v77_v15  ;;  %347 = vmatpush.msra.mxu2 %v77_v15 }
  0x2e   :  { %113 = vmatmul.f32.vlgmr.msra.gmra.mxu0 %v75_v16  ;;  %116 = vmatmul.f32.vlgmr.msra.gmra.mxu2 %v76_v17 }
  0xab   :  { %v114_v19 = vpop.f32.mrf.mxu0 }
  0xac   :  { %v545_v20 = vadd.f32 %v370_v18, %v114_v19 }
  0xae   :  { %v548_v21 = vmul.f32 0.70710677, %v545_v20 }
  0xb0   :  { %v124_v22 = vmul.f32 %v548_v21, %v548_v21 }
  0xb1   :  { %v117_v23 = vpop.f32.mrf.mxu2 }
  0xb2   :  { %v125_v24 = vmin.f32 %v124_v22, 16.0  ;;  %v552_v25 = vadd.f32 %v370_v18, %v117_v23 }
  0xb4   :  { %v555_v26 = vmul.f32 0.70710677, %v552_v25  ;;  %v137_v27 = vmul.f32 3.8918573e-05, %v125_v24  ;;  %v126_v29 = vmul.f32 2.1237322e-06, %v125_v24 }
  0xb6   :  { %v164_v28 = vmul.f32 %v555_v26, %v555_v26  ;;  %v138_v30 = vadd.f32 0.001143296, %v137_v27  ;;  %v127_v35 = vadd.f32 0.00028619796, %v126_v29 }
  0xb8   :  { %v165_v31 = vmin.f32 %v164_v28, 16.0  ;;  %v139_v32 = vmul.f32 %v138_v30, %v125_v24  ;;  %v128_v42 = vmul.f32 %v127_v35, %v125_v24 }
  0xba   :  { %v166_v33 = vmul.f32 2.1237322e-06, %v165_v31  ;;  %v177_v34 = vmul.f32 3.8918573e-05, %v165_v31  ;;  %v140_v36 = vadd.f32 0.014752088, %v139_v32 }
  0xbb   :  { %v129_v48 = vadd.f32 0.0036580483, %v128_v42 }
  0xbc   :  { %v167_v37 = vadd.f32 0.00028619796, %v166_v33  ;;  %v178_v38 = vadd.f32 0.001143296, %v177_v34  ;;  %v141_v39 = vmul.f32 %v140_v36, %v125_v24  ;;  %v121_v34 = vmul.f32 0.5, %v552_v25 }
  0xbd   :  { %v130_v54 = vmul.f32 %v129_v48, %v125_v24 }
  0xbe   :  { %v168_v40 = vmul.f32 %v167_v37, %v165_v31  ;;  %v179_v41 = vmul.f32 %v178_v38, %v165_v31  ;;  %v142_v43 = vadd.f32 0.112945676, %v141_v39  ;;  %v120_v39 = vmul.f32 0.5, %v545_v20 }
  0xbf   :  { %v131_v59 = vadd.f32 0.05243302, %v130_v54  ;;  %v279_v54 = vld [vmem:[#allocation8 + $0x50] sm:$0xff] }
  0xc0   :  { %v180_v44 = vadd.f32 0.014752088, %v179_v41  ;;  %v169_v45 = vadd.f32 0.0036580483, %v168_v40  ;;  %v143_v46 = vmul.f32 %v142_v43, %v125_v24  ;;  %v284_v40 = vld [vmem:[#allocation8 + $0x78] sm:$0xff]  ;;  %v283_v41 = vld [vmem:[#allocation8 + $0x70] sm:$0xff] }
  0xc1   :  { %v132_v63 = vmul.f32 %v131_v59, %v125_v24  ;;  %348 = vmatpush.msra.mxu3 %v284_v40  ;;  %285 = vmatpush.msra.mxu1 %v284_v40  ;;  %v274_v59 = vld [vmem:[#allocation8 + $0x28] sm:$0xff] }
  0xc2   :  { %v181_v47 = vmul.f32 %v180_v44, %v165_v31  ;;  %v144_v49 = vadd.f32 0.4994258, %v143_v46  ;;  %v170_v51 = vmul.f32 %v169_v45, %v165_v31 }
  0xc3   :  { %v133_v3 = vadd.f32 0.18741608, %v132_v63  ;;  %349 = vmatpush.msra.mxu3 %v283_v41  ;;  %286 = vmatpush.msra.mxu1 %v283_v41  ;;  %v270_v63 = vld [vmem:[#allocation8 + $0x8] sm:$0xff] }
  0xc4   :  { %v182_v50 = vadd.f32 0.112945676, %v181_v47  ;;  %v145_v52 = vmul.f32 %v144_v49, %v125_v24  ;;  %v171_v57 = vadd.f32 0.05243302, %v170_v51  ;;  %v282_v51 = vld [vmem:[#allocation8 + $0x68] sm:$0xff] }
  0xc5   :  { %v134_v8 = vmul.f32 %v133_v3, %v125_v24  ;;  %350 = vmatpush.msra.mxu3 %v282_v51  ;;  %287 = vmatpush.msra.mxu1 %v282_v51 }
  0xc6   :  { %v183_v53 = vmul.f32 %v182_v50, %v165_v31  ;;  %v146_v55 = vadd.f32 1.0, %v145_v52  ;;  %v172_v61 = vmul.f32 %v171_v57, %v165_v31  ;;  %v281_v52 = vld [vmem:[#allocation8 + $0x60] sm:$0xff]  ;;  %v276_v57 = vld [vmem:[#allocation8 + $0x38] sm:$0xff] }
  0xc7   :  { %v135_v17 = vadd.f32 1.1283791, %v134_v8  ;;  %351 = vmatpush.msra.mxu3 %v281_v52  ;;  %288 = vmatpush.msra.mxu1 %v281_v52 }
  0xc8   :  { %v184_v56 = vadd.f32 0.4994258, %v183_v53  ;;  %373 = vrcp.f32 %v146_v55  ;;  %v173_v1 = vadd.f32 0.18741608, %v172_v61  ;;  %vm152_vm1 = vweird.f32 %v146_v55  ;;  %v280_v53 = vld [vmem:[#allocation8 + $0x58] sm:$0xff] }
  0xc9   :  { %v156_v12 = vand.u32 2147483647, %v146_v55  ;;  %v158_v13 = vand.u32 2147483648, %v146_v55  ;;  %v136_v30 = vmul.f32 %v135_v17, %v548_v21  ;;  %v216_v21 = vlaneseq  ;;  %352 = vmatpush.msra.mxu3 %v280_v53  ;;  %289 = vmatpush.msra.mxu1 %v280_v53  ;;  %v272_v61 = vld [vmem:[#allocation8 + $0x18] sm:$0xff] }
  0xca   :  { %v185_v58 = vmul.f32 %v184_v56, %v165_v31  ;;  %v174_v6 = vmul.f32 %v173_v1, %v165_v31  ;;  %v277_v56 = vld [vmem:[#allocation8 + $0x40] sm:$0xff] }
  0xcb   :  { %v159_v23 = vor.u32 1.1754944e-38, %v158_v13  ;;  %vm157_vm7 = vcmp.eq.f32.partialorder %v156_v12, 8.507059e+37  ;;  %v217_v42 = vand.u32 127, %v216_v21  ;;  %353 = vmatpush.msra.mxu3 %v279_v54  ;;  %290 = vmatpush.msra.mxu1 %v279_v54 }
  0xcc   :  { %v186_v60 = vadd.f32 1.0, %v185_v58  ;;  %v175_v14 = vadd.f32 1.1283791, %v174_v6  ;;  %v275_v58 = vld [vmem:[#allocation8 + $0x30] sm:$0xff] }
  0xcd   :  { %vm218_vm8 = vcmp.lt.s32.totalorder %v217_v42, 32 }
  0xce   :  { %375 = vrcp.f32 %v186_v60  ;;  %v374_v62 = vpop.eup %373  ;;  %v198_v11 = vand.u32 2147483648, %v186_v60  ;;  %v196_v16 = vand.u32 2147483647, %v186_v60  ;;  %vm192_vm4 = vweird.f32 %v186_v60 }
  0xcf   :  { %v148_v0 = vmul.f32 %v374_v62, %v146_v55  ;;  %vm153_vm0 = vweird.f32 %v374_v62  ;;  %v176_v24 = vmul.f32 %v175_v14, %v555_v26  ;;  %v278_v55 = vld [vmem:[#allocation8 + $0x48] sm:$0xff] }
  0xd0   :  { %vm154_vm3 = vmor %vm152_vm1, %vm153_vm0  ;;  %v199_v22 = vor.u32 1.1754944e-38, %v198_v11  ;;  %vm197_vm6 = vcmp.eq.f32.partialorder %v196_v16, 8.507059e+37  ;;  %354 = vmatpush.msra.mxu3 %v278_v55  ;;  %291 = vmatpush.msra.mxu1 %v278_v55 }
  0xd1   :  { %v149_v2 = vsub.f32 1.0, %v148_v0  ;;  %v269_v0 = vld [vmem:[#allocation8] sm:$0xff] }
  0xd2   :  { %355 = vmatpush.msra.mxu3 %v277_v56  ;;  %292 = vmatpush.msra.mxu1 %v277_v56 }
  0xd3   :  { %v150_v5 = vmul.f32 %v374_v62, %v149_v2 }
  0xd4   :  { %v376_v4 = vpop.eup %375  ;;  %356 = vmatpush.msra.mxu3 %v276_v57  ;;  %293 = vmatpush.msra.mxu1 %v276_v57 }
  0xd5   :  { %v188_v7 = vmul.f32 %v376_v4, %v186_v60  ;;  %v151_v10 = vadd.f32 %v374_v62, %v150_v5  ;;  %vm193_vm2 = vweird.f32 %v376_v4  ;;  %v273_v60 = vld [vmem:[#allocation8 + $0x20] sm:$0xff] }
  0xd6   :  { %vm194_vm5 = vmor %vm192_vm4, %vm193_vm2  ;;  %357 = vmatpush.msra.mxu3 %v275_v58  ;;  %294 = vmatpush.msra.mxu1 %v275_v58 }
  0xd7   :  { %v189_v9 = vsub.f32 1.0, %v188_v7  ;;  %v155_v19 = vsel %vm154_vm3, %v374_v62, %v151_v10  ;;  %v271_v62 = vld [vmem:[#allocation8 + $0x10] sm:$0xff] }
  0xd8   :  { %v160_v29 = vsel %vm157_vm7, %v159_v23, %v155_v19  ;;  %358 = vmatpush.msra.mxu3 %v274_v59  ;;  %295 = vmatpush.msra.mxu1 %v274_v59  ;;  %v372_v19 = vld [vmem:[%s589_s4] ss:$0 sm:$0xff]  ;;  %s316_s4 = sshll.u32 %s591_s6, 4  ;;  %s317_s4 = int_to_ptr.hbm [resolvable:$true] %s316_s4 }
  0xd9   :  { %v190_v15 = vmul.f32 %v376_v4, %v189_v9  ;;  %v161_v33 = vmul.f32 %v160_v29, %v136_v30 }
  0xda   :  { %359 = vmatpush.msra.mxu3 %v273_v60  ;;  %296 = vmatpush.msra.mxu1 %v273_v60 }
  0xdb   :  { %v191_v18 = vadd.f32 %v376_v4, %v190_v15  ;;  %v330_v37 = vclamps-f32 %v161_v33, 1.0  ;;  %v371_v15 = vld [vmem:[%s588_s3] ss:$0 sm:$0xff]  ;;  %s488_s3 = smov [#allocation9]  }
  0xdc   :  { %360 = vmatpush.msra.mxu3 %v272_v61  ;;  %297 = vmatpush.msra.mxu1 %v272_v61  ;;  %s314_s16 = sshll.u32 %s488_s3, 4  ;;  %s315_s16 = int_to_ptr.vmem [resolvable:$true] %s314_s16 }
  0xdd   :  { %v195_v27 = vsel %vm194_vm5, %v376_v4, %v191_v18  ;;  %v204_v38 = vadd.f32 1.0, %v330_v37 }
  0xde   :  { %v200_v28 = vsel %vm197_vm6, %v199_v22, %v195_v27  ;;  %361 = vmatpush.msra.mxu3 %v271_v62  ;;  %298 = vmatpush.msra.mxu1 %v271_v62 }
  0xdf   :  { %v201_v31 = vmul.f32 %v200_v28, %v176_v24  ;;  %v206_v26 = vmul.f32 %v204_v38, %v120_v39 }
  0xe0   :  { %362 = vmatpush.msra.mxu3 %v270_v63  ;;  %299 = vmatpush.msra.mxu1 %v270_v63 }
  0xe1   :  { %v331_v32 = vclamps-f32 %v201_v31, 1.0 }
  0xe2   :  { %363 = vmatpush.msra.mxu3 %v269_v0  ;;  %300 = vmatpush.msra.mxu1 %v269_v0 }
  0xe3   :  { %v205_v35 = vadd.f32 1.0, %v331_v32 }
  0xe5   :  { %v207_v36 = vmul.f32 %v205_v35, %v121_v34 }
  0xe7   :  { %210 = vadd.xlane.f32.xlu0 %v207_v36 }
  0xef   :  { %208 = vadd.xlane.f32.xlu0 %v206_v26 }
 0x15a   :  { %v211_v43 = vpop.xlane.xlu0 %210 }
 0x15b   :  { %v213_v44 = vmul.f32 0.03125, %v211_v43 }
 0x15d   :  { %v215_v25 = vsub.f32 %v207_v36, %v213_v44 }
 0x15f   :  { %v563_v45 = vsel %vm218_vm8, %v215_v25, 0.0 }
 0x160   :  { %v222_v46 = vmul.f32 %v563_v45, %v563_v45 }
 0x162   :  { %225 = vadd.xlane.f32.xlu1 %v222_v46  ;;  %v209_v20 = vpop.xlane.xlu0 %208 }
 0x163   :  { %v212_v47 = vmul.f32 0.03125, %v209_v20 }
 0x165   :  { %v214_v48 = vsub.f32 %v206_v26, %v212_v47 }
 0x167   :  { %v567_v49 = vsel %vm218_vm8, %v214_v48, 0.0 }
 0x168   :  { %v221_v50 = vmul.f32 %v567_v49, %v567_v49 }
 0x16a   :  { %223 = vadd.xlane.f32.xlu1 %v221_v50 }
 0x1d5   :  { %v226_v1 = vpop.xlane.xlu1 %225 }
 0x1d6   :  { %v228_v2 = vmul.f32 0.03125, %v226_v1 }
 0x1d8   :  { %v230_v3 = vadd.f32 1e-12, %v228_v2 }
 0x1da   :  { %377 = vrsqrt.f32 %v230_v3  ;;  %vm247_vm10 = vweird.f32 %v230_v3 }
 0x1dd   :  { %v224_v4 = vpop.xlane.xlu1 %223 }
 0x1de   :  { %v227_v5 = vmul.f32 0.03125, %v224_v4 }
 0x1e0   :  { %v378_v6 = vpop.eup %377  ;;  %v229_v7 = vadd.f32 1e-12, %v227_v5 }
 0x1e1   :  { %v242_v8 = vmul.f32 %v378_v6, %v230_v3  ;;  %vm248_vm9 = vweird.f32 %v378_v6 }
 0x1e2   :  { %379 = vrsqrt.f32 %v229_v7  ;;  %vm249_vm11 = vmor %vm247_vm10, %vm248_vm9  ;;  %vm237_vm13 = vweird.f32 %v229_v7 }
 0x1e3   :  { %v243_v9 = vmul.f32 %v378_v6, %v242_v8 }
 0x1e5   :  { %v244_v10 = vmul.f32 0.5, %v243_v9 }
 0x1e7   :  { %v245_v11 = vsub.f32 1.5, %v244_v10 }
 0x1e8   :  { %v380_v12 = vpop.eup %379 }
 0x1e9   :  { %v246_v13 = vmul.f32 %v378_v6, %v245_v11  ;;  %v232_v14 = vmul.f32 %v380_v12, %v229_v7  ;;  %vm238_vm12 = vweird.f32 %v380_v12 }
 0x1ea   :  { %vm239_vm14 = vmor %vm237_vm13, %vm238_vm12 }
 0x1eb   :  { %v233_v16 = vmul.f32 %v380_v12, %v232_v14  ;;  %v250_v17 = vsel %vm249_vm11, %v378_v6, %v246_v13 }
 0x1ec   :  { %v252_v18 = vmul.f32 %v250_v17, %v563_v45 }
 0x1ed   :  { %v234_v22 = vmul.f32 0.5, %v233_v16 }
 0x1ee   :  { %v258_v23 = vmul.f32 %v371_v15, %v252_v18 }
 0x1ef   :  { %v235_v24 = vsub.f32 1.5, %v234_v22 }
 0x1f0   :  { %v264_v27 = vadd.f32 %v372_v19, %v258_v23 }
 0x1f1   :  { %v236_v28 = vmul.f32 %v380_v12, %v235_v24 }
 0x1f2   :  { %304 = vmatmul.f32.vlgmr.msra.gmra.mxu3 %v264_v27 }
 0x1f3   :  { %v240_v29 = vsel %vm239_vm14, %v380_v12, %v236_v28 }
 0x1f4   :  { %v251_v30 = vmul.f32 %v240_v29, %v567_v49 }
 0x1f6   :  { %v257_v31 = vmul.f32 %v371_v15, %v251_v30 }
 0x1f8   :  { %v263_v32 = vadd.f32 %v372_v19, %v257_v31 }
 0x1fa   :  { %301 = vmatmul.f32.vlgmr.msra.gmra.mxu1 %v263_v32 }
 0x275   :  { %v305_v33 = vpop.f32.mrf.mxu3 }
 0x276   :  { %309 = vst [vmem:[#allocation9 + $0x8] sm:$0xff] %v305_v33 }
 0x277   :  { %v302_v34 = vpop.f32.mrf.mxu1 }
 0x278   :  { %308 = vst [vmem:[#allocation9] sm:$0xff] %v302_v34 }
 0x279   :  { %322 = dma.vmem_to_hbm [thread:$0]  %s315_s16, 256, %s317_s4, [#allocation5], %s484_s29, %s484_s29, %s485_s30  }
 0x27a   :  { %481 = dma.done.wait [#allocation5], 256  }
 0x27b   :  { %482 = vsyncadd [#allocation5], 4294967040 }
 0x27c   :  { %327 = vsyncpa [#allocation4], 1 }
 0x27d   :  { %328 = vsyncpa [#allocation7], 1 }
 0x27e   :  { %329 = vsyncpa [#allocation5], 1 }

</bundles_post_ra>
